<compile_context>
chip_gen: v7x
topology: tpu7x:2x2x1
jax: 0.10.0
libtpu: 0.0.40
codegen_flags: <defaults>
</compile_context>

<pallas_src>
import functools

import jax
import jax.numpy as jnp
from jax.experimental import pallas as pl
from jax.experimental.pallas import tpu as pltpu

_VMEM_LIMIT = 40 * 1024 * 1024   # safe on v5e/v6e (128 MiB) and v7x (64 MiB/TC)


# ---------------------------------------------------------------------------
# Fused q/k/v projection: one MXU pass over x, bf16 channel-major outputs
# ---------------------------------------------------------------------------
def _qkv_proj_kernel(x_ref, w_ref, b_ref, q_ref, k_ref, v_ref, *, dq, dv):
    xb = x_ref[...].astype(jnp.bfloat16)
    y = jnp.dot(xb, w_ref[...], preferred_element_type=jnp.float32) + b_ref[...]
    q_ref[...] = y[:, :dq].astype(q_ref.dtype)
    k_ref[...] = y[:, dq:2 * dq].astype(k_ref.dtype)
    v_ref[...] = y[:, 2 * dq:2 * dq + dv].astype(v_ref.dtype)


def qkv_projection(x2d, w_qkv, b_qkv, *, dq, dv, tm=512):
    n, din = x2d.shape
    dtot = w_qkv.shape[1]
    tm = min(tm, n)
    kern = functools.partial(_qkv_proj_kernel, dq=dq, dv=dv)
    return pl.pallas_call(
        kern,
        out_shape=(
            jax.ShapeDtypeStruct((n, dq), jnp.bfloat16),
            jax.ShapeDtypeStruct((n, dq), jnp.bfloat16),
            jax.ShapeDtypeStruct((n, dv), jnp.bfloat16),
        ),
        grid=(pl.cdiv(n, tm),),
        in_specs=[
            pl.BlockSpec((tm, din), lambda i: (i, 0)),
            pl.BlockSpec((din, dtot), lambda i: (0, 0)),
            pl.BlockSpec((1, dtot), lambda i: (0, 0)),
        ],
        out_specs=(
            pl.BlockSpec((tm, dq), lambda i: (i, 0)),
            pl.BlockSpec((tm, dq), lambda i: (i, 0)),
            pl.BlockSpec((tm, dv), lambda i: (i, 0)),
        ),
        compiler_params=pltpu.CompilerParams(
            dimension_semantics=("parallel",),
            vmem_limit_bytes=_VMEM_LIMIT),
    )(x2d, w_qkv, b_qkv)


# ---------------------------------------------------------------------------
# Depthwise 5x5 conv (lepe), one batch element per grid step.
# Halo padding is built in a VMEM scratch (no XLA-side jnp.pad pass over v).
# ---------------------------------------------------------------------------
def _dwconv_kernel(x_ref, w_ref, b_ref, o_ref, xp_ref, *, H, W, K, P):
    C = x_ref.shape[-1]
    xp_ref[...] = jnp.zeros_like(xp_ref)                       # zero halo
    xp_ref[P:P + H, P:P + W, :] = x_ref[0].astype(jnp.float32)  # interior
    xp = xp_ref[...]                                            # (H+2P, W+2P, C)
    wgt = w_ref[...]                                            # (K, K, C)
    acc = jnp.zeros((H, W, C), jnp.float32)
    # TODO(synk): for v7x, strip-tile H across the grid so both TensorCores get
    # work when batch is small; kept a simple per-batch kernel (minor path).
    for dy in range(K):
        for dx in range(K):
            acc = acc + xp[dy:dy + H, dx:dx + W, :] * wgt[dy, dx, :][None, None, :]
    o_ref[0] = (acc + b_ref[...]).astype(o_ref.dtype)


def dwconv2d(v, w_kkc, bias, *, kernel_size=5, padding=2):
    b, h, w, c = v.shape
    kern = functools.partial(_dwconv_kernel, H=h, W=w, K=kernel_size, P=padding)
    return pl.pallas_call(
        kern,
        out_shape=jax.ShapeDtypeStruct((b, h, w, c), jnp.bfloat16),
        grid=(b,),
        in_specs=[
            pl.BlockSpec((1, h, w, c), lambda i: (i, 0, 0, 0)),
            pl.BlockSpec((kernel_size, kernel_size, c), lambda i: (0, 0, 0)),
            pl.BlockSpec((1, 1, c), lambda i: (0, 0, 0)),
        ],
        out_specs=pl.BlockSpec((1, h, w, c), lambda i: (i, 0, 0, 0)),
        scratch_shapes=[
            pltpu.VMEM((h + 2 * padding, w + 2 * padding, c), jnp.float32)],
        compiler_params=pltpu.CompilerParams(
            dimension_semantics=("parallel",),
            vmem_limit_bytes=_VMEM_LIMIT),
    )(v, w_kkc, bias.reshape(1, 1, c))


# ---------------------------------------------------------------------------
# Retention kernel: fused rotary + width-softmax-attn + height-softmax-attn.
# One batch element with ALL heads per grid step; channel-major (lane-dense)
# HBM blocks; per-head narrow math stays in VMEM/registers.
# ---------------------------------------------------------------------------
def _retention_kernel(q_ref, k_ref, v_ref, sin_ref, cos_ref, rot_ref,
                      mw_ref, mh_ref, o_ref, v1s_ref, os_ref,
                      *, H, W, nh, kd, hd):
    dq = nh * kd
    dv = nh * hd
    sin = sin_ref[...]                             # (H*W, dq) f32
    cos = cos_ref[...]
    rot = rot_ref[...]                             # (dq, dq) bf16 pair-rotation

    def theta_shift(xb):                           # xb: (H*W, dq) bf16
        xr = jnp.dot(xb, rot, preferred_element_type=jnp.float32)
        return xb.astype(jnp.float32) * cos + xr * sin

    qr3 = theta_shift(q_ref[...]).reshape(H, W, dq)            # f32
    kr3 = theta_shift(k_ref[...]).reshape(H, W, dq)
    v3 = v_ref[...].reshape(H, W, dv)                          # bf16

    qrb = qr3.astype(jnp.bfloat16)
    krb = kr3.astype(jnp.bfloat16)
    # one wide relayout per tensor for the height pass (instead of per-head)
    qrTb = jnp.transpose(qr3, (1, 0, 2)).astype(jnp.bfloat16)  # (W, H, dq)
    krTb = jnp.transpose(kr3, (1, 0, 2)).astype(jnp.bfloat16)

    # ---- stage 1: width attention (rows are the batch dim) ----
    for n in range(nh):
        qh = qrb[:, :, n * kd:(n + 1) * kd]
        kh = krb[:, :, n * kd:(n + 1) * kd]
        vh = v3[:, :, n * hd:(n + 1) * hd]
        s = jax.lax.dot_general(qh, kh, (((2,), (2,)), ((0,), (0,))),
                                preferred_element_type=jnp.float32)    # (H, W, W)
        s = s + mw_ref[n][None, :, :]
        s = s - jnp.max(s, axis=-1, keepdims=True)
        p = jnp.exp(s)
        a = p * pl.reciprocal(jnp.sum(p, axis=-1, keepdims=True), approx=True)
        v1 = jax.lax.dot_general(a.astype(jnp.bfloat16), vh,
                                 (((2,), (1,)), ((0,), (0,))),
                                 preferred_element_type=jnp.float32)   # (H, W, hd)
        v1s_ref[:, :, n * hd:(n + 1) * hd] = v1

    v1T = jnp.transpose(v1s_ref[...], (1, 0, 2)).astype(jnp.bfloat16)  # (W, H, dv)

    # ---- stage 2: height attention (columns are the batch dim) ----
    for n in range(nh):
        qh = qrTb[:, :, n * kd:(n + 1) * kd]
        kh = krTb[:, :, n * kd:(n + 1) * kd]
        vh = v1T[:, :, n * hd:(n + 1) * hd]
        s = jax.lax.dot_general(qh, kh, (((2,), (2,)), ((0,), (0,))),
                                preferred_element_type=jnp.float32)    # (W, H, H)
        s = s + mh_ref[n][None, :, :]
        s = s - jnp.max(s, axis=-1, keepdims=True)
        p = jnp.exp(s)
        a = p * pl.reciprocal(jnp.sum(p, axis=-1, keepdims=True), approx=True)
        o = jax.lax.dot_general(a.astype(jnp.bfloat16), vh,
                                (((2,), (1,)), ((0,), (0,))),
                                preferred_element_type=jnp.float32)    # (W, H, hd)
        os_ref[:, :, n * hd:(n + 1) * hd] = o

    # single wide relayout back to row-major order + one lane-dense store
    o_ref[...] = (jnp.transpose(os_ref[...], (1, 0, 2))
                  .reshape(H * W, dv).astype(o_ref.dtype))


def retention_attention(q2, k2, v2, sin2, cos2, rot, mask_w, mask_h,
                        *, b, h, w, num_heads):
    n, dq = q2.shape
    dv = v2.shape[-1]
    hw = h * w
    kd = dq // num_heads
    hd = dv // num_heads
    kern = functools.partial(_retention_kernel, H=h, W=w, nh=num_heads,
                             kd=kd, hd=hd)
    # NOTE: for very large head counts one can split the head axis into
    # lane-dense groups (>=128 lanes) via an extra grid axis on the column
    # BlockSpecs; at these sizes all heads fit one lane-dense block.
    return pl.pallas_call(
        kern,
        out_shape=jax.ShapeDtypeStruct((n, dv), jnp.bfloat16),
        grid=(b,),
        in_specs=[
            pl.BlockSpec((hw, dq), lambda bi: (bi, 0)),
            pl.BlockSpec((hw, dq), lambda bi: (bi, 0)),
            pl.BlockSpec((hw, dv), lambda bi: (bi, 0)),
            pl.BlockSpec((hw, dq), lambda bi: (0, 0)),
            pl.BlockSpec((hw, dq), lambda bi: (0, 0)),
            pl.BlockSpec((dq, dq), lambda bi: (0, 0)),
            pl.BlockSpec((num_heads, w, w), lambda bi: (0, 0, 0)),
            pl.BlockSpec((num_heads, h, h), lambda bi: (0, 0, 0)),
        ],
        out_specs=pl.BlockSpec((hw, dv), lambda bi: (bi, 0)),
        scratch_shapes=[
            pltpu.VMEM((h, w, dv), jnp.float32),
            pltpu.VMEM((w, h, dv), jnp.float32),
        ],
        compiler_params=pltpu.CompilerParams(
            dimension_semantics=("parallel",),
            vmem_limit_bytes=_VMEM_LIMIT),
    )(q2, k2, v2, sin2, cos2, rot, mask_w, mask_h)


# ---------------------------------------------------------------------------
# Output projection with fused lepe residual: out = (att + lepe) @ Wo + bo
# One K=dv matmul per row tile (no per-head tiny-K dots).
# ---------------------------------------------------------------------------
def _out_proj_kernel(att_ref, lepe_ref, w_ref, b_ref, o_ref):
    s = (att_ref[...].astype(jnp.float32)
         + lepe_ref[...].astype(jnp.float32)).astype(jnp.bfloat16)
    o_ref[...] = (jnp.dot(s, w_ref[...], preferred_element_type=jnp.float32)
                  + b_ref[...]).astype(o_ref.dtype)


def out_projection(att2d, lepe2d, wo, bo, *, tm=512):
    n, dv = att2d.shape
    dout = wo.shape[1]
    tm = min(tm, n)
    return pl.pallas_call(
        _out_proj_kernel,
        out_shape=jax.ShapeDtypeStruct((n, dout), jnp.float32),
        grid=(pl.cdiv(n, tm),),
        in_specs=[
            pl.BlockSpec((tm, dv), lambda i: (i, 0)),
            pl.BlockSpec((tm, dv), lambda i: (i, 0)),
            pl.BlockSpec((dv, dout), lambda i: (0, 0)),
            pl.BlockSpec((1, dout), lambda i: (0, 0)),
        ],
        out_specs=pl.BlockSpec((tm, dout), lambda i: (i, 0)),
        compiler_params=pltpu.CompilerParams(
            dimension_semantics=("parallel",),
            vmem_limit_bytes=_VMEM_LIMIT),
    )(att2d, lepe2d, wo, bo)


# ---------------------------------------------------------------------------
# Forward pass (Pallas-backed), matching VisionRetentionChunk.forward
# ---------------------------------------------------------------------------
def vision_retention_chunk_forward(x, params, rel_pos, num_heads):
    (sin, cos), (mask_h, mask_w) = rel_pos
    b, h, w, c = x.shape
    key_dim = c // num_heads
    dv = params["wv"].shape[1]
    scaling = key_dim ** (-0.5)
    n = b * h * w
    hw = h * w

    # fused q|k|v weight (k-scaling folded in); bf16 for the MXU
    w_qkv = jnp.concatenate(
        [params["wq"], params["wk"] * scaling, params["wv"]], axis=1
    ).astype(jnp.bfloat16)
    b_qkv = jnp.concatenate(
        [params["bq"], params["bk"] * scaling, params["bv"]]).reshape(1, -1)

    x2d = x.reshape(n, c)
    q2, k2, v2 = qkv_projection(x2d, w_qkv, b_qkv, dq=c, dv=dv)

    # lepe consumes the SAME bf16 channel-major v buffer (no second copy of v)
    lepe = dwconv2d(v2.reshape(b, h, w, dv), params["w_dw"], params["b_dw"])

    # rotate_every_two(x) == x @ rot, block-diagonal 2x2 [[0,1],[-1,0]] blocks,
    # tiled over the full channel-major width so one bf16 dot covers all heads
    rot = jnp.kron(jnp.eye(c // 2, dtype=jnp.float32),
                   jnp.array([[0.0, 1.0], [-1.0, 0.0]], jnp.float32)
                   ).astype(jnp.bfloat16)
    sin2 = jnp.tile(sin.reshape(hw, key_dim), (1, num_heads))
    cos2 = jnp.tile(cos.reshape(hw, key_dim), (1, num_heads))

    att = retention_attention(q2, k2, v2, sin2, cos2, rot, mask_w, mask_h,
                              b=b, h=h, w=w, num_heads=num_heads)   # (N, dv) bf16

    out2d = out_projection(att, lepe.reshape(n, dv),
                           params["wo"].astype(jnp.bfloat16),
                           params["bo"].reshape(1, -1))
    return out2d.reshape(b, h, w, c)


# ---------------------------------------------------------------------------
# Pure-JAX reference (for correctness check)
# ---------------------------------------------------------------------------
def rotate_every_two(x):
    x1 = x[..., 0::2]
    x2 = x[..., 1::2]
    return jnp.stack([-x2, x1], axis=-1).reshape(x.shape)


def theta_shift(x, sin, cos):
    return x * cos + rotate_every_two(x) * sin


def reference_forward(x, params, rel_pos, num_heads):
    (sin, cos), (mask_h, mask_w) = rel_pos
    b, h, w, c = x.shape
    key_dim = c // num_heads
    scaling = key_dim ** (-0.5)

    q = x @ params["wq"] + params["bq"]
    k = x @ params["wk"] + params["bk"]
    v = x @ params["wv"] + params["bv"]

    cch = v.shape[-1]
    ker = params["w_dw"].reshape(5, 5, 1, cch)
    lepe = jax.lax.conv_general_dilated(
        v, ker, window_strides=(1, 1), padding=((2, 2), (2, 2)),
        dimension_numbers=("NHWC", "HWIO", "NHWC"),
        feature_group_count=cch) + params["b_dw"]

    k = k * scaling
    q = q.reshape(b, h, w, num_heads, key_dim).transpose(0, 3, 1, 2, 4)
    k = k.reshape(b, h, w, num_heads, key_dim).transpose(0, 3, 1, 2, 4)
    qr = theta_shift(q, sin, cos)
    kr = theta_shift(k, sin, cos)

    qr_w = qr.transpose(0, 2, 1, 3, 4)
    kr_w = kr.transpose(0, 2, 1, 3, 4)
    vv = v.reshape(b, h, w, num_heads, -1).transpose(0, 1, 3, 2, 4)
    qk_w = jnp.einsum("bhnwk,bhnvk->bhnwv", qr_w, kr_w) + mask_w
    a_w = jax.nn.softmax(qk_w, axis=-1)
    vv = jnp.einsum("bhnwv,bhnvd->bhnwd", a_w, vv)

    qr_h = qr.transpose(0, 3, 1, 2, 4)
    kr_h = kr.transpose(0, 3, 1, 2, 4)
    vv = vv.transpose(0, 3, 2, 1, 4)
    qk_h = jnp.einsum("bwnhk,bwngk->bwnhg", qr_h, kr_h) + mask_h
    a_h = jax.nn.softmax(qk_h, axis=-1)
    out = jnp.einsum("bwnhg,bwngd->bwnhd", a_h, vv)

    out = out.transpose(0, 3, 1, 2, 4).reshape(b, h, w, -1)
    out = out + lepe
    return out @ params["wo"] + params["bo"]


# ---------------------------------------------------------------------------
# Deterministic parameter / input construction and run
# ---------------------------------------------------------------------------
def xavier_normal(key, fan_in, fan_out, gain):
    std = gain * (2.0 / (fan_in + fan_out)) ** 0.5
    return std * jax.random.normal(key, (fan_in, fan_out), jnp.float32)


if __name__ == "__main__":
    b, h, w = 2, 8, 8
    embed_dim, num_heads, factor = 32, 4, 1
    key_dim = embed_dim // num_heads

    keys = jax.random.split(jax.random.PRNGKey(0), 16)
    gain = 2.0 ** (-2.5)
    params = {
        "wq": xavier_normal(keys[0], embed_dim, embed_dim, gain),
        "bq": 0.02 * jax.random.normal(keys[1], (embed_dim,), jnp.float32),
        "wk": xavier_normal(keys[2], embed_dim, embed_dim, gain),
        "bk": 0.02 * jax.random.normal(keys[3], (embed_dim,), jnp.float32),
        "wv": xavier_normal(keys[4], embed_dim, embed_dim * factor, gain),
        "bv": 0.02 * jax.random.normal(keys[5], (embed_dim * factor,), jnp.float32),
        "wo": xavier_normal(keys[6], embed_dim * factor, embed_dim, 1.0),
        "bo": jnp.zeros((embed_dim,), jnp.float32),
        # depthwise 5x5 conv: weight stored as (5, 5, C); C = embed_dim * factor
        "w_dw": 0.1 * jax.random.normal(keys[7], (5, 5, embed_dim * factor), jnp.float32),
        "b_dw": 0.01 * jax.random.normal(keys[8], (embed_dim * factor,), jnp.float32),
    }

    # rel_pos: ((sin, cos), (mask_h, mask_w))
    angles = jax.random.uniform(keys[9], (h, w, key_dim), jnp.float32) * 6.283
    sin, cos = jnp.sin(angles), jnp.cos(angles)
    mask_h = 0.5 * jax.random.normal(keys[10], (num_heads, h, h), jnp.float32)
    mask_w = 0.5 * jax.random.normal(keys[11], (num_heads, w, w), jnp.float32)
    rel_pos = ((sin, cos), (mask_h, mask_w))

    x = jax.random.normal(keys[12], (b, h, w, embed_dim), jnp.float32)

    out = vision_retention_chunk_forward(x, params, rel_pos, num_heads)
    out = jax.block_until_ready(out)

    ref = reference_forward(x, params, rel_pos, num_heads)
    max_err = float(jnp.max(jnp.abs(out - ref)))
    assert out.shape == (b, h, w, embed_dim)
    # bf16 HBM intermediates + bf16 MXU inputs + approx reciprocal introduce a
    # small, documented drift vs. the pure-f32 reference
    assert max_err < 3e-2, f"mismatch vs reference: {max_err}"
    print("KERNEL_OK")
</pallas_src>

<mosaic_0001>
module attributes {stable_mosaic.version = 11 : i64} {
  func.func @_qkv_proj_kernel(%arg0: i32, %arg1: memref<128x32xf32, #tpu.memory_space<vmem>>, %arg2: memref<32x96xbf16, #tpu.memory_space<vmem>>, %arg3: memref<1x96xf32, #tpu.memory_space<vmem>>, %arg4: memref<128x32xbf16, #tpu.memory_space<vmem>>, %arg5: memref<128x32xbf16, #tpu.memory_space<vmem>>, %arg6: memref<128x32xbf16, #tpu.memory_space<vmem>>) attributes {dimension_semantics = [#tpu.dimension_semantics<parallel>], iteration_bounds = array<i64: 1>, scalar_prefetch = 0 : i64, scratch_operands = 0 : i64, tpu.core_type = #tpu.core_type<tc>, window_params = [{transform_indices = @transform_0, window_bounds = array<i64: 128, 32>}, {pipeline_mode = #tpu.pipeline_mode<synchronous>, transform_indices = @transform_1, window_bounds = array<i64: 32, 96>}, {pipeline_mode = #tpu.pipeline_mode<synchronous>, transform_indices = @transform_2, window_bounds = array<i64: 1, 96>}, {transform_indices = @transform_3, window_bounds = array<i64: 128, 32>}, {transform_indices = @transform_4, window_bounds = array<i64: 128, 32>}, {transform_indices = @transform_5, window_bounds = array<i64: 128, 32>}]} {
    %c0 = arith.constant 0 : index
    %c0_0 = arith.constant 0 : index
    %0 = vector.load %arg1[%c0, %c0_0] : memref<128x32xf32, #tpu.memory_space<vmem>>, vector<128x32xf32>
    %1 = arith.truncf %0 : vector<128x32xf32> to vector<128x32xbf16>
    %c0_1 = arith.constant 0 : index
    %c0_2 = arith.constant 0 : index
    %2 = vector.load %arg2[%c0_1, %c0_2] : memref<32x96xbf16, #tpu.memory_space<vmem>>, vector<32x96xbf16>
    %cst = arith.constant dense<0.000000e+00> : vector<128x96xf32>
    %3 = tpu.matmul %1, %2, %cst {dimension_numbers = #tpu.dot_dimension_numbers<[1], [0], [0], [1], [0, 0, 1, 1], [], []>} : vector<128x32xbf16>, vector<32x96xbf16>, vector<128x96xf32> -> vector<128x96xf32>
    %c0_3 = arith.constant 0 : index
    %c0_4 = arith.constant 0 : index
    %4 = vector.load %arg3[%c0_3, %c0_4] : memref<1x96xf32, #tpu.memory_space<vmem>>, vector<1x96xf32>
    %5 = vector.broadcast %4 : vector<1x96xf32> to vector<128x96xf32>
    %6 = arith.addf %3, %5 : vector<128x96xf32>
    %7 = vector.extract_strided_slice %6 {offsets = [0, 0], sizes = [128, 32], strides = [1, 1]} : vector<128x96xf32> to vector<128x32xf32>
    %8 = arith.truncf %7 : vector<128x32xf32> to vector<128x32xbf16>
    %c0_5 = arith.constant 0 : index
    %c0_6 = arith.constant 0 : index
    %9 = vector.load %arg4[%c0_5, %c0_6] : memref<128x32xbf16, #tpu.memory_space<vmem>>, vector<128x32xbf16>
    tpu.vector_store %arg4[%c0_5, %c0_6], %8 {strides = array<i32>} : memref<128x32xbf16, #tpu.memory_space<vmem>>, vector<128x32xbf16>,
    %10 = vector.extract_strided_slice %6 {offsets = [0, 32], sizes = [128, 32], strides = [1, 1]} : vector<128x96xf32> to vector<128x32xf32>
    %11 = arith.truncf %10 : vector<128x32xf32> to vector<128x32xbf16>
    %c0_7 = arith.constant 0 : index
    %c0_8 = arith.constant 0 : index
    %12 = vector.load %arg5[%c0_7, %c0_8] : memref<128x32xbf16, #tpu.memory_space<vmem>>, vector<128x32xbf16>
    tpu.vector_store %arg5[%c0_7, %c0_8], %11 {strides = array<i32>} : memref<128x32xbf16, #tpu.memory_space<vmem>>, vector<128x32xbf16>,
    %13 = vector.extract_strided_slice %6 {offsets = [0, 64], sizes = [128, 32], strides = [1, 1]} : vector<128x96xf32> to vector<128x32xf32>
    %14 = arith.truncf %13 : vector<128x32xf32> to vector<128x32xbf16>
    %c0_9 = arith.constant 0 : index
    %c0_10 = arith.constant 0 : index
    %15 = vector.load %arg6[%c0_9, %c0_10] : memref<128x32xbf16, #tpu.memory_space<vmem>>, vector<128x32xbf16>
    tpu.vector_store %arg6[%c0_9, %c0_10], %14 {strides = array<i32>} : memref<128x32xbf16, #tpu.memory_space<vmem>>, vector<128x32xbf16>,
    return
  }
  func.func @transform_0(%arg0: i32) -> (i32, i32) {
    %c0_i32 = arith.constant 0 : i32
    %c0_i32_0 = arith.constant 0 : i32
    return %arg0, %c0_i32 : i32, i32
  }
  func.func @transform_1(%arg0: i32) -> (i32, i32) {
    %c0_i32 = arith.constant 0 : i32
    %c0_i32_0 = arith.constant 0 : i32
    %c0_i32_1 = arith.constant 0 : i32
    return %c0_i32, %c0_i32_0 : i32, i32
  }
  func.func @transform_2(%arg0: i32) -> (i32, i32) {
    %c0_i32 = arith.constant 0 : i32
    %c0_i32_0 = arith.constant 0 : i32
    %c0_i32_1 = arith.constant 0 : i32
    return %c0_i32, %c0_i32_0 : i32, i32
  }
  func.func @transform_3(%arg0: i32) -> (i32, i32) {
    %c0_i32 = arith.constant 0 : i32
    %c0_i32_0 = arith.constant 0 : i32
    return %arg0, %c0_i32 : i32, i32
  }
  func.func @transform_4(%arg0: i32) -> (i32, i32) {
    %c0_i32 = arith.constant 0 : i32
    %c0_i32_0 = arith.constant 0 : i32
    return %arg0, %c0_i32 : i32, i32
  }
  func.func @transform_5(%arg0: i32) -> (i32, i32) {
    %c0_i32 = arith.constant 0 : i32
    %c0_i32_0 = arith.constant 0 : i32
    return %arg0, %c0_i32 : i32, i32
  }
}

</mosaic_0001>

<bundles_post_ra>
// kernel: tpu_custom_call.1
= control target key start
LH: loop header
LB: loop body
LE: loop exit
PB: predicated region body
PF: predicated region fallthrough
CT: control target
= control target key end

     0   :  { %vm65_vm0 = vcmask 261120   ;;  %vm251_vm1 = vcmask 257024   ;;  %s489_s6 = smov 96   ;;  %s490_s19 = smov 64   ;;  %s810_s1 = inlined_call_operand.vmem [shape: bf16[32,96], index: 1, kind: input, shape index: {}]   ;;  %s811_s0 = inlined_call_operand.vmem [shape: f32[128,32], index: 0, kind: input, shape index: {}]   ;;  %s812_s2 = inlined_call_operand.vmem [shape: f32[1,96], index: 2, kind: input, shape index: {}]   ;;  %s813_s3 = inlined_call_operand.vmem [shape: bf16[128,32], index: 3, kind: output, shape index: {0}]   ;;  %s814_s4 = inlined_call_operand.vmem [shape: bf16[128,32], index: 4, kind: output, shape index: {1}]   ;;  %s815_s5 = inlined_call_operand.vmem [shape: bf16[128,32], index: 5, kind: output, shape index: {2}]  }
   0x1   :  { %v487_v0 = vld [vmem:[%s810_s1] sm:$0xff]   ;;  %v488_v1 = vld [vmem:[%s810_s1 + $0x8] sm:$0xff]   ;;  %v20_v7 = vld [vmem:[%s811_s0 + $0x10] sm:$0xff] }
   0x2   :  { %461 = vmatprep.subr.bf16.mxu0 %v487_v0  ;;  %481 = vmatprep.subr.bf16.mxu1 %v487_v0  ;;  %v18_v2 = vld [vmem:[%s811_s0] sm:$0xff]  ;;  %v19_v3 = vld [vmem:[%s811_s0 + $0x8] sm:$0xff]  ;;  %v21_v8 = vld [vmem:[%s811_s0 + $0x18] sm:$0xff] }
   0x3   :  { %v26_v4 = vld [vmem:[%s811_s0 + $0x40] sm:$0xff]  ;;  %462 = vmatpush3.bf16.msra.mxu0 %v487_v0  ;;  %483 = vmatpush3.bf16.msra.mxu1 %v487_v0  ;;  %v34_v5 = vpack.c.bf16 %v19_v3, %v18_v2  ;;  %v27_v6 = vld [vmem:[%s811_s0 + $0x48] sm:$0xff]  ;;  %v28_v10 = vld [vmem:[%s811_s0 + $0x50] sm:$0xff]  ;;  %v35_v14 = vpack.c.bf16 %v21_v8, %v20_v7 }
   0x4   :  { %463 = vmatprep.subr.bf16.mxu0 %v488_v1  ;;  %482 = vmatprep.subr.bf16.mxu1 %v488_v1  ;;  %v38_v9 = vpack.c.bf16 %v27_v6, %v26_v4  ;;  %v29_v11 = vld [vmem:[%s811_s0 + $0x58] sm:$0xff]  ;;  %v22_v12 = vld [vmem:[%s811_s0 + $0x20] sm:$0xff]  ;;  %v23_v13 = vld [vmem:[%s811_s0 + $0x28] sm:$0xff] }
   0x5   :  { %465 = vmatprep.mubr.msk.bf16.mxu0 %vm65_vm0, %v34_v5  ;;  %v39_v15 = vpack.c.bf16 %v29_v11, %v28_v10  ;;  %v30_v16 = vld [vmem:[%s811_s0 + $0x60] sm:$0xff]  ;;  %v31_v17 = vld [vmem:[%s811_s0 + $0x68] sm:$0xff]  ;;  %v36_v18 = vpack.c.bf16 %v23_v13, %v22_v12  ;;  %v24_v20 = vld [vmem:[%s811_s0 + $0x30] sm:$0xff] }
   0x6   :  { %473 = vmatprep.mubr.msk.bf16.mxu1 %vm65_vm0, %v38_v9  ;;  %v40_v19 = vpack.c.bf16 %v31_v17, %v30_v16  ;;  %v25_v21 = vld [vmem:[%s811_s0 + $0x38] sm:$0xff]  ;;  %v32_v22 = vld [vmem:[%s811_s0 + $0x70] sm:$0xff]  ;;  %v408_v26 = vld [vmem:[%s812_s2] ss:$0 sm:$0xff] }
   0x7   :  { %464 = vmatpush3.bf16.msra.mxu0 %v488_v1  ;;  %484 = vmatpush3.bf16.msra.mxu1 %v488_v1  ;;  %v33_v23 = vld [vmem:[%s811_s0 + $0x78] sm:$0xff]  ;;  %v37_v24 = vpack.c.bf16 %v25_v21, %v24_v20 }
   0x8   :  { %v41_v25 = vpack.c.bf16 %v33_v23, %v32_v22 }
   0xa   :  { %466 = vmatmul.mubr.msk.bf16.vlgmr.msra.gmra.mrb[0].mxu0 %vm65_vm0, %v35_v14  ;;  %474 = vmatmul.mubr.msk.bf16.vlgmr.msra.gmra.mrb[0].mxu1 %vm65_vm0, %v39_v15 }
   0xb   :  { %469 = vmatprep.mubr.msk.bf16.mxu0 %vm65_vm0, %v36_v18  ;;  %477 = vmatprep.mubr.msk.bf16.mxu1 %vm65_vm0, %v40_v19 }
  0x12   :  { %470 = vmatmul.mubr.msk.bf16.gmra.mrb[4].mxu0 %vm65_vm0, %v37_v24  ;;  %478 = vmatmul.mubr.msk.bf16.gmra.mrb[4].mxu1 %vm65_vm0, %v41_v25 }
  0xdd   :  { %v467_v27 = vpop.f32.mrb[0].mxu0  ;;  %v475_v28 = vpop.f32.mrb[0].mxu1 }
  0xde   :  { %v133_v29 = vadd.f32 %v467_v27, %v408_v26  ;;  %v165_v30 = vadd.f32 %v475_v28, %v408_v26  ;;  %v124_v31 = vpop.f32.mrb[1].mxu0  ;;  %v156_v32 = vpop.f32.mrb[1].mxu1 }
  0xdf   :  { %v125_v33 = vadd.f32 %v408_v26, %v124_v31  ;;  %v157_v34 = vadd.f32 %v408_v26, %v156_v32  ;;  %v468_v35 = vpop.f32.mrb[2].mxu0  ;;  %v476_v36 = vpop.f32.mrb[2].mxu1 }
  0xe0   :  { %v437_v37 = vpack.c.bf16 %v133_v29, %v133_v29  ;;  %v445_v38 = vpack.c.bf16 %v165_v30, %v165_v30  ;;  %v136_v39 = vadd.f32 %v468_v35, %v408_v26  ;;  %v168_v40 = vadd.f32 %v476_v36, %v408_v26  ;;  %v127_v41 = vpop.f32.mrb[3].mxu0  ;;  %v159_v42 = vpop.f32.mrb[3].mxu1 }
  0xe1   :  { %v435_v43 = vpack.c.bf16 %v125_v33, %v125_v33  ;;  %v443_v44 = vpack.c.bf16 %v157_v34, %v157_v34  ;;  %v128_v45 = vadd.f32 %v408_v26, %v127_v41  ;;  %v160_v46 = vadd.f32 %v408_v26, %v159_v42 }
  0xe2   :  { %254 = vst.msk [vmem:[%s813_s3 + $0x8] sm:$0xf] %vm251_vm1, %v437_v37  ;;  %262 = vst.msk [vmem:[%s813_s3 + $0x28] sm:$0xf] %vm251_vm1, %v445_v38  ;;  %v438_v47 = vpack.c.bf16 %v136_v39, %v136_v39  ;;  %v446_v48 = vpack.c.bf16 %v168_v40, %v168_v40  ;;  %288 = vrot.lane.b32.xlu0 %v445_v38, %s489_s6  ;;  %272 = vrot.lane.b32.xlu1 %v437_v37, %s489_s6 }
  0xe3   :  { %252 = vst.msk [vmem:[%s813_s3] sm:$0xf] %vm251_vm1, %v435_v43  ;;  %260 = vst.msk [vmem:[%s813_s3 + $0x20] sm:$0xf] %vm251_vm1, %v443_v44  ;;  %v436_v49 = vpack.c.bf16 %v128_v45, %v128_v45  ;;  %v444_v50 = vpack.c.bf16 %v160_v46, %v160_v46 }
  0xe4   :  { %255 = vst.msk [vmem:[%s813_s3 + $0xc] sm:$0xf] %vm251_vm1, %v438_v47  ;;  %263 = vst.msk [vmem:[%s813_s3 + $0x2c] sm:$0xf] %vm251_vm1, %v446_v48 }
  0xe5   :  { %253 = vst.msk [vmem:[%s813_s3 + $0x4] sm:$0xf] %vm251_vm1, %v436_v49  ;;  %261 = vst.msk [vmem:[%s813_s3 + $0x24] sm:$0xf] %vm251_vm1, %v444_v50  ;;  %v471_v51 = vpop.f32.mrb[4].mxu0  ;;  %v479_v52 = vpop.f32.mrb[4].mxu1 }
  0xe6   :  { %336 = vrot.lane.b32.xlu0 %v437_v37, %s490_s19  ;;  %274 = vrot.lane.b32.xlu1 %v438_v47, %s489_s6  ;;  %v149_v53 = vadd.f32 %v471_v51, %v408_v26  ;;  %v140_v54 = vpop.f32.mrb[5].mxu0  ;;  %v181_v55 = vadd.f32 %v479_v52, %v408_v26  ;;  %v172_v56 = vpop.f32.mrb[5].mxu1 }
  0xe7   :  { %v141_v57 = vadd.f32 %v408_v26, %v140_v54  ;;  %v472_v58 = vpop.f32.mrb[6].mxu0  ;;  %v173_v59 = vadd.f32 %v408_v26, %v172_v56  ;;  %v480_v60 = vpop.f32.mrb[6].mxu1 }
  0xe8   :  { %v441_v61 = vpack.c.bf16 %v149_v53, %v149_v53  ;;  %v152_v62 = vadd.f32 %v472_v58, %v408_v26  ;;  %v143_v63 = vpop.f32.mrb[7].mxu0  ;;  %v449_v0 = vpack.c.bf16 %v181_v55, %v181_v55  ;;  %v184_v1 = vadd.f32 %v480_v60, %v408_v26  ;;  %v175_v2 = vpop.f32.mrb[7].mxu1 }
  0xe9   :  { %v439_v3 = vpack.c.bf16 %v141_v57, %v141_v57  ;;  %v144_v4 = vadd.f32 %v408_v26, %v143_v63  ;;  %v447_v5 = vpack.c.bf16 %v173_v59, %v173_v59  ;;  %v176_v6 = vadd.f32 %v408_v26, %v175_v2 }
  0xea   :  { %352 = vrot.lane.b32.xlu0 %v445_v38, %s490_s19  ;;  %290 = vrot.lane.b32.xlu1 %v446_v48, %s489_s6  ;;  %258 = vst.msk [vmem:[%s813_s3 + $0x18] sm:$0xf] %vm251_vm1, %v441_v61  ;;  %v442_v7 = vpack.c.bf16 %v152_v62, %v152_v62  ;;  %266 = vst.msk [vmem:[%s813_s3 + $0x38] sm:$0xf] %vm251_vm1, %v449_v0  ;;  %v450_v8 = vpack.c.bf16 %v184_v1, %v184_v1 }
  0xeb   :  { %256 = vst.msk [vmem:[%s813_s3 + $0x10] sm:$0xf] %vm251_vm1, %v439_v3  ;;  %v440_v9 = vpack.c.bf16 %v144_v4, %v144_v4  ;;  %264 = vst.msk [vmem:[%s813_s3 + $0x30] sm:$0xf] %vm251_vm1, %v447_v5  ;;  %v448_v10 = vpack.c.bf16 %v176_v6, %v176_v6 }
  0xec   :  { %259 = vst.msk [vmem:[%s813_s3 + $0x1c] sm:$0xf] %vm251_vm1, %v442_v7  ;;  %267 = vst.msk [vmem:[%s813_s3 + $0x3c] sm:$0xf] %vm251_vm1, %v450_v8 }
  0xed   :  { %257 = vst.msk [vmem:[%s813_s3 + $0x14] sm:$0xf] %vm251_vm1, %v440_v9  ;;  %265 = vst.msk [vmem:[%s813_s3 + $0x34] sm:$0xf] %vm251_vm1, %v448_v10 }
  0xee   :  { %338 = vrot.lane.b32.xlu1 %v438_v47, %s490_s19  ;;  %268 = vrot.lane.b32.xlu0 %v435_v43, %s489_s6 }
  0xf2   :  { %354 = vrot.lane.b32.xlu1 %v446_v48, %s490_s19  ;;  %284 = vrot.lane.b32.xlu0 %v443_v44, %s489_s6 }
  0xf6   :  { %286 = vrot.lane.b32.xlu1 %v444_v50, %s489_s6  ;;  %332 = vrot.lane.b32.xlu0 %v435_v43, %s490_s19 }
  0xfa   :  { %334 = vrot.lane.b32.xlu1 %v436_v49, %s490_s19  ;;  %348 = vrot.lane.b32.xlu0 %v443_v44, %s490_s19 }
  0xfe   :  { %350 = vrot.lane.b32.xlu1 %v444_v50, %s490_s19  ;;  %270 = vrot.lane.b32.xlu0 %v436_v49, %s489_s6 }
 0x102   :  { %282 = vrot.lane.b32.xlu1 %v442_v7, %s489_s6  ;;  %280 = vrot.lane.b32.xlu0 %v441_v61, %s489_s6 }
 0x106   :  { %298 = vrot.lane.b32.xlu1 %v450_v8, %s489_s6  ;;  %296 = vrot.lane.b32.xlu0 %v449_v0, %s489_s6 }
 0x10a   :  { %346 = vrot.lane.b32.xlu1 %v442_v7, %s490_s19  ;;  %344 = vrot.lane.b32.xlu0 %v441_v61, %s490_s19 }
 0x10e   :  { %278 = vrot.lane.b32.xlu1 %v440_v9, %s489_s6  ;;  %276 = vrot.lane.b32.xlu0 %v439_v3, %s489_s6 }
 0x112   :  { %294 = vrot.lane.b32.xlu1 %v448_v10, %s489_s6  ;;  %292 = vrot.lane.b32.xlu0 %v447_v5, %s489_s6 }
 0x116   :  { %342 = vrot.lane.b32.xlu1 %v440_v9, %s490_s19  ;;  %340 = vrot.lane.b32.xlu0 %v439_v3, %s490_s19 }
 0x11a   :  { %358 = vrot.lane.b32.xlu1 %v448_v10, %s490_s19  ;;  %356 = vrot.lane.b32.xlu0 %v447_v5, %s490_s19 }
 0x11e   :  { %362 = vrot.lane.b32.xlu1 %v450_v8, %s490_s19  ;;  %360 = vrot.lane.b32.xlu0 %v449_v0, %s490_s19 }
 0x154   :  { %v289_v11 = vpop.permute.xlu0 %288  ;;  %v273_v12 = vpop.permute.xlu1 %272 }
 0x155   :  { %326 = vst.msk [vmem:[%s814_s4 + $0x28] sm:$0xf] %vm251_vm1, %v289_v11  ;;  %318 = vst.msk [vmem:[%s814_s4 + $0x8] sm:$0xf] %vm251_vm1, %v273_v12 }
 0x158   :  { %v337_v13 = vpop.permute.xlu0 %336  ;;  %v275_v14 = vpop.permute.xlu1 %274 }
 0x159   :  { %382 = vst.msk [vmem:[%s815_s5 + $0x8] sm:$0xf] %vm251_vm1, %v337_v13  ;;  %319 = vst.msk [vmem:[%s814_s4 + $0xc] sm:$0xf] %vm251_vm1, %v275_v14 }
 0x15c   :  { %v353_v15 = vpop.permute.xlu0 %352  ;;  %v291_v16 = vpop.permute.xlu1 %290 }
 0x15d   :  { %390 = vst.msk [vmem:[%s815_s5 + $0x28] sm:$0xf] %vm251_vm1, %v353_v15  ;;  %327 = vst.msk [vmem:[%s814_s4 + $0x2c] sm:$0xf] %vm251_vm1, %v291_v16 }
 0x160   :  { %v339_v17 = vpop.permute.xlu1 %338  ;;  %v269_v18 = vpop.permute.xlu0 %268 }
 0x161   :  { %383 = vst.msk [vmem:[%s815_s5 + $0xc] sm:$0xf] %vm251_vm1, %v339_v17  ;;  %316 = vst.msk [vmem:[%s814_s4] sm:$0xf] %vm251_vm1, %v269_v18 }
 0x164   :  { %v355_v19 = vpop.permute.xlu1 %354  ;;  %v285_v20 = vpop.permute.xlu0 %284 }
 0x165   :  { %391 = vst.msk [vmem:[%s815_s5 + $0x2c] sm:$0xf] %vm251_vm1, %v355_v19  ;;  %324 = vst.msk [vmem:[%s814_s4 + $0x20] sm:$0xf] %vm251_vm1, %v285_v20 }
 0x168   :  { %v287_v21 = vpop.permute.xlu1 %286  ;;  %v333_v22 = vpop.permute.xlu0 %332 }
 0x169   :  { %325 = vst.msk [vmem:[%s814_s4 + $0x24] sm:$0xf] %vm251_vm1, %v287_v21  ;;  %380 = vst.msk [vmem:[%s815_s5] sm:$0xf] %vm251_vm1, %v333_v22 }
 0x16c   :  { %v335_v23 = vpop.permute.xlu1 %334  ;;  %v349_v24 = vpop.permute.xlu0 %348 }
 0x16d   :  { %381 = vst.msk [vmem:[%s815_s5 + $0x4] sm:$0xf] %vm251_vm1, %v335_v23  ;;  %388 = vst.msk [vmem:[%s815_s5 + $0x20] sm:$0xf] %vm251_vm1, %v349_v24 }
 0x170   :  { %v351_v25 = vpop.permute.xlu1 %350  ;;  %v271_v26 = vpop.permute.xlu0 %270 }
 0x171   :  { %389 = vst.msk [vmem:[%s815_s5 + $0x24] sm:$0xf] %vm251_vm1, %v351_v25  ;;  %317 = vst.msk [vmem:[%s814_s4 + $0x4] sm:$0xf] %vm251_vm1, %v271_v26 }
 0x174   :  { %v283_v27 = vpop.permute.xlu1 %282  ;;  %v281_v28 = vpop.permute.xlu0 %280 }
 0x175   :  { %323 = vst.msk [vmem:[%s814_s4 + $0x1c] sm:$0xf] %vm251_vm1, %v283_v27  ;;  %322 = vst.msk [vmem:[%s814_s4 + $0x18] sm:$0xf] %vm251_vm1, %v281_v28 }
 0x178   :  { %v299_v29 = vpop.permute.xlu1 %298  ;;  %v297_v30 = vpop.permute.xlu0 %296 }
 0x179   :  { %331 = vst.msk [vmem:[%s814_s4 + $0x3c] sm:$0xf] %vm251_vm1, %v299_v29  ;;  %330 = vst.msk [vmem:[%s814_s4 + $0x38] sm:$0xf] %vm251_vm1, %v297_v30 }
 0x17c   :  { %v347_v31 = vpop.permute.xlu1 %346  ;;  %v345_v32 = vpop.permute.xlu0 %344 }
 0x17d   :  { %387 = vst.msk [vmem:[%s815_s5 + $0x1c] sm:$0xf] %vm251_vm1, %v347_v31  ;;  %386 = vst.msk [vmem:[%s815_s5 + $0x18] sm:$0xf] %vm251_vm1, %v345_v32 }
 0x180   :  { %v279_v33 = vpop.permute.xlu1 %278  ;;  %v277_v34 = vpop.permute.xlu0 %276 }
 0x181   :  { %321 = vst.msk [vmem:[%s814_s4 + $0x14] sm:$0xf] %vm251_vm1, %v279_v33  ;;  %320 = vst.msk [vmem:[%s814_s4 + $0x10] sm:$0xf] %vm251_vm1, %v277_v34 }
 0x184   :  { %v295_v35 = vpop.permute.xlu1 %294  ;;  %v293_v36 = vpop.permute.xlu0 %292 }
 0x185   :  { %329 = vst.msk [vmem:[%s814_s4 + $0x34] sm:$0xf] %vm251_vm1, %v295_v35  ;;  %328 = vst.msk [vmem:[%s814_s4 + $0x30] sm:$0xf] %vm251_vm1, %v293_v36 }
 0x188   :  { %v343_v37 = vpop.permute.xlu1 %342  ;;  %v341_v38 = vpop.permute.xlu0 %340 }
 0x189   :  { %385 = vst.msk [vmem:[%s815_s5 + $0x14] sm:$0xf] %vm251_vm1, %v343_v37  ;;  %384 = vst.msk [vmem:[%s815_s5 + $0x10] sm:$0xf] %vm251_vm1, %v341_v38 }
 0x18c   :  { %v359_v39 = vpop.permute.xlu1 %358  ;;  %v357_v40 = vpop.permute.xlu0 %356 }
 0x18d   :  { %393 = vst.msk [vmem:[%s815_s5 + $0x34] sm:$0xf] %vm251_vm1, %v359_v39  ;;  %392 = vst.msk [vmem:[%s815_s5 + $0x30] sm:$0xf] %vm251_vm1, %v357_v40 }
 0x190   :  { %v363_v41 = vpop.permute.xlu1 %362  ;;  %v361_v42 = vpop.permute.xlu0 %360 }
 0x191   :  { %395 = vst.msk [vmem:[%s815_s5 + $0x3c] sm:$0xf] %vm251_vm1, %v363_v41  ;;  %394 = vst.msk [vmem:[%s815_s5 + $0x38] sm:$0xf] %vm251_vm1, %v361_v42 }

</bundles_post_ra>
